<compile_context>
chip_gen: v7x
topology: tpu7x:2x2x1
jax: 0.10.0
libtpu: 0.0.40
codegen_flags: <defaults>
</compile_context>

<pallas_src>
import functools
import math

import jax
import jax.numpy as jnp
from jax.experimental import pallas as pl
from jax.experimental.pallas import tpu as pltpu


# ----------------------------------------------------------------------------- kernels

def _layernorm_kernel(alpha_ref, bias_ref, x_ref, o_ref, *, eps: float, hidden: int):
    """Simple layout: one logical row per tile row, reduction over the lane axis."""
    x = x_ref[...].astype(jnp.float32)             # (block_rows, hidden)
    n = float(hidden)
    mean = jnp.sum(x, axis=-1, keepdims=True) * (1.0 / n)
    d = x - mean                                   # centered (two-pass, no cancellation)
    var = jnp.sum(d * d, axis=-1, keepdims=True) * (1.0 / (n - 1.0))  # unbiased
    scale = alpha_ref[0] * jax.lax.rsqrt(var + eps)
    o_ref[...] = (d * scale + bias_ref[0]).astype(o_ref.dtype)


def _layernorm_packed_kernel(alpha_ref, bias_ref, x_ref, o_ref, *,
                             eps: float, hidden: int, k: int):
    """Packed layout for hidden < 128 (hidden divides 128): k logical rows share one
    128-lane tile row. Per-row statistics via exact masked segmented reductions."""
    lanes = k * hidden
    x = x_ref[...].astype(jnp.float32)             # (block_prows, lanes)
    bp = x.shape[0]
    lane_id = jax.lax.broadcasted_iota(jnp.int32, (bp, lanes), 1)

    n = float(hidden)
    # Per-segment mean, broadcast back onto the lanes of its segment.
    mean_b = jnp.zeros_like(x)
    for s in range(k):
        m = (lane_id >= s * hidden) & (lane_id < (s + 1) * hidden)
        seg_sum = jnp.sum(jnp.where(m, x, 0.0), axis=-1, keepdims=True)
        mean_b = jnp.where(m, seg_sum * (1.0 / n), mean_b)

    d = x - mean_b
    dd = d * d
    var_b = jnp.zeros_like(x)
    for s in range(k):
        m = (lane_id >= s * hidden) & (lane_id < (s + 1) * hidden)
        seg_sq = jnp.sum(jnp.where(m, dd, 0.0), axis=-1, keepdims=True)
        var_b = jnp.where(m, seg_sq * (1.0 / (n - 1.0)), var_b)

    scale_b = alpha_ref[0] * jax.lax.rsqrt(var_b + eps)
    o_ref[...] = (d * scale_b + bias_ref[0]).astype(o_ref.dtype)


# ----------------------------------------------------------------------------- sizing

def _sublane_pack(itemsize: int) -> int:
    return {4: 8, 2: 16, 1: 32}.get(itemsize, 8)


def _vmem_config():
    """Generation-aware (budget_for_tiles, vmem_limit_bytes)."""
    cap = None
    try:
        cap = int(getattr(pltpu.get_tpu_info(), "vmem_capacity_bytes"))
    except Exception:
        cap = None
    if not cap or cap <= 0:
        cap = 64 * 1024 * 1024            # conservative default: v7x per-TC VMEM
    # Headroom under physical capacity: v7x (64 MiB) -> 56 MiB limit; 128 MiB parts -> 100 MiB.
    vmem_limit = max(16 * 1024 * 1024, min(cap - 8 * 1024 * 1024, 100 * 1024 * 1024))
    budget = (2 * vmem_limit) // 3        # leave room for compiler scratch / semaphores
    return budget, vmem_limit


def _pick_block_rows(rows: int, lanes: int, itemsize: int,
                     vmem_budget_bytes: int, min_grid_steps: int = 8) -> int:
    """Largest row tile that (a) fits the VMEM budget with double-buffered in/out plus
    f32 temporaries and (b) still leaves >= min_grid_steps grid steps for pipelining."""
    pack = _sublane_pack(itemsize)
    if rows <= pack:
        return rows                       # tiny input: single full block (no pipelining possible)
    # Per-row bytes: in + out double-buffered (2x each) + f32 upcast + centered diff + ~1 temp.
    bytes_per_row = lanes * (4 * itemsize + 12)
    cap = max(pack, vmem_budget_bytes // max(bytes_per_row, 1))
    cap = max(pack, (cap // pack) * pack)
    # Never collapse to a 1-step grid: aim for >= min_grid_steps blocks.
    target = -(-rows // min_grid_steps)               # cdiv
    target = max(pack, -(-target // pack) * pack)     # round up to the sublane pack
    return max(pack, min(cap, target))


# ----------------------------------------------------------------------------- wrapper

def layer_normalization(x, alpha, bias, *, eps: float = 1e-6,
                        block_rows: int | None = None):
    """x: (..., hidden); alpha, bias: shape (1,) float32 scalar parameters."""
    orig_shape = x.shape
    hidden = orig_shape[-1]
    if hidden < 2:
        raise ValueError("hidden must be >= 2 (unbiased std divides by N-1).")
    rows = math.prod(orig_shape[:-1]) if len(orig_shape) > 1 else 1

    # Lane-dense packing for small hidden: fold k = 128 // hidden rows into one 128-lane row.
    k = 128 // hidden if (hidden < 128 and 128 % hidden == 0) else 1
    use_packed = k > 1 and rows % k == 0
    if use_packed:
        lanes = k * hidden
        eff_rows = rows // k
        kernel = functools.partial(_layernorm_packed_kernel, eps=eps, hidden=hidden, k=k)
    else:
        lanes = hidden
        eff_rows = rows
        kernel = functools.partial(_layernorm_kernel, eps=eps, hidden=hidden)

    x2 = x.reshape(eff_rows, lanes)       # row-major reshape: no HBM copy

    itemsize = jnp.dtype(x.dtype).itemsize
    pack = _sublane_pack(itemsize)
    budget, vmem_limit = _vmem_config()

    if block_rows is None:
        br = _pick_block_rows(eff_rows, lanes, itemsize, budget)
    else:
        # Align user-supplied value to the sublane pack and clamp to the row count.
        br = max(pack, min(int(block_rows), eff_rows))
        br = max(pack, (br // pack) * pack)
        if br >= eff_rows:
            br = eff_rows

    grid = (pl.cdiv(eff_rows, br),)       # ragged last block handled by Pallas (rows independent)

    out = pl.pallas_call(
        kernel,
        out_shape=jax.ShapeDtypeStruct((eff_rows, lanes), x.dtype),
        grid=grid,
        in_specs=[
            pl.BlockSpec(memory_space=pltpu.SMEM),          # alpha (1,)
            pl.BlockSpec(memory_space=pltpu.SMEM),          # bias  (1,)
            pl.BlockSpec((br, lanes), lambda i: (i, 0)),
        ],
        out_specs=pl.BlockSpec((br, lanes), lambda i: (i, 0)),
        compiler_params=pltpu.CompilerParams(
            # TODO(synk): on v7x, pltpu.CORE_PARALLEL on the row axis could force per-core
            # codegen; "parallel" is kept for portability across v5e/v6e/v7x.
            dimension_semantics=("parallel",),
            vmem_limit_bytes=vmem_limit,
        ),
    )(alpha, bias, x2)

    return out.reshape(orig_shape)


# ----------------------------------------------------------------------------- test

def _reference(x, alpha, bias, eps):
    x32 = x.astype(jnp.float32)
    mean = jnp.mean(x32, axis=-1, keepdims=True)
    var = jnp.var(x32, axis=-1, keepdims=True, ddof=1)   # unbiased, like torch.std
    return (alpha * (x32 - mean) / jnp.sqrt(var + eps) + bias).astype(x.dtype)


if __name__ == "__main__":
    key = jax.random.PRNGKey(0)
    alpha = jnp.ones((1,), dtype=jnp.float32)    # nn.Parameter(torch.ones(1))
    bias = jnp.zeros((1,), dtype=jnp.float32)    # nn.Parameter(torch.zeros(1))
    eps = 1e-6

    # Case 1: module demo shape (small hidden -> packed lane-dense path).
    batch, seq, hidden = 2, 8, 32
    x = jax.random.normal(key, (batch, seq, hidden), dtype=jnp.float32)
    out = jax.block_until_ready(layer_normalization(x, alpha, bias, eps=eps))
    ref = _reference(x, alpha, bias, eps)
    assert out.shape == x.shape and out.dtype == x.dtype
    assert jnp.allclose(out, ref, atol=1e-5, rtol=1e-5), "mismatch vs reference (packed path)"

    # Case 2: hidden multiple of 128 (simple lane-dense path, multi-step pipelined grid).
    x2 = jax.random.normal(jax.random.PRNGKey(1), (4, 16, 128), dtype=jnp.float32)
    out2 = jax.block_until_ready(layer_normalization(x2, alpha, bias, eps=eps))
    ref2 = _reference(x2, alpha, bias, eps)
    assert out2.shape == x2.shape and out2.dtype == x2.dtype
    assert jnp.allclose(out2, ref2, atol=1e-5, rtol=1e-5), "mismatch vs reference (simple path)"

    print("KERNEL_OK")
</pallas_src>

<mosaic_0001>
module attributes {stable_mosaic.version = 11 : i64} {
  func.func @_layernorm_packed_kernel(%arg0: i32, %arg1: memref<1xf32, #tpu.memory_space<smem>>, %arg2: memref<1xf32, #tpu.memory_space<smem>>, %arg3: memref<4x128xf32, #tpu.memory_space<vmem>>, %arg4: memref<4x128xf32, #tpu.memory_space<vmem>>) attributes {dimension_semantics = [#tpu.dimension_semantics<parallel>], iteration_bounds = array<i64: 1>, scalar_prefetch = 0 : i64, scratch_operands = 0 : i64, tpu.core_type = #tpu.core_type<tc>, window_params = [{transform_indices = @transform_0, window_bounds = array<i64: 1>}, {transform_indices = @transform_1, window_bounds = array<i64: 1>}, {transform_indices = @transform_2, window_bounds = array<i64: 4, 128>}, {transform_indices = @transform_3, window_bounds = array<i64: 4, 128>}]} {
    %c0 = arith.constant 0 : index
    %c0_0 = arith.constant 0 : index
    %0 = vector.load %arg3[%c0, %c0_0] : memref<4x128xf32, #tpu.memory_space<vmem>>, vector<4x128xf32>
    %1 = tpu.iota {dimensions = array<i32: 1>} : vector<4x128xi32>
    %cst = arith.constant 0.000000e+00 : f32
    %2 = vector.broadcast %cst : f32 to vector<4x128xf32>
    %c0_i32 = arith.constant 0 : i32
    %3 = vector.broadcast %c0_i32 : i32 to vector<4x128xi32>
    %4 = arith.cmpi sge, %1, %3 : vector<4x128xi32>
    %c32_i32 = arith.constant 32 : i32
    %5 = vector.broadcast %c32_i32 : i32 to vector<4x128xi32>
    %6 = arith.cmpi slt, %1, %5 : vector<4x128xi32>
    %7 = arith.andi %4, %6 : vector<4x128xi1>
    %cst_1 = arith.constant 0.000000e+00 : f32
    %8 = vector.broadcast %cst_1 : f32 to vector<4x128xf32>
    %9 = arith.select %7, %0, %8 : vector<4x128xi1>, vector<4x128xf32>
    %cst_2 = arith.constant dense<0.000000e+00> : vector<4xf32>
    %10 = vector.multi_reduction <add>, %9, %cst_2 [1] : vector<4x128xf32> to vector<4xf32>
    %11 = vector.shape_cast %10 : vector<4xf32> to vector<4x1xf32>
    %cst_3 = arith.constant 3.125000e-02 : f32
    %12 = vector.broadcast %cst_3 : f32 to vector<4x1xf32>
    %13 = arith.mulf %11, %12 : vector<4x1xf32>
    %14 = vector.shape_cast %13 : vector<4x1xf32> to vector<4x1xf32>
    %15 = vector.broadcast %14 : vector<4x1xf32> to vector<4x128xf32>
    %16 = arith.select %7, %15, %2 : vector<4x128xi1>, vector<4x128xf32>
    %c32_i32_4 = arith.constant 32 : i32
    %17 = vector.broadcast %c32_i32_4 : i32 to vector<4x128xi32>
    %18 = arith.cmpi sge, %1, %17 : vector<4x128xi32>
    %c64_i32 = arith.constant 64 : i32
    %19 = vector.broadcast %c64_i32 : i32 to vector<4x128xi32>
    %20 = arith.cmpi slt, %1, %19 : vector<4x128xi32>
    %21 = arith.andi %18, %20 : vector<4x128xi1>
    %cst_5 = arith.constant 0.000000e+00 : f32
    %22 = vector.broadcast %cst_5 : f32 to vector<4x128xf32>
    %23 = arith.select %21, %0, %22 : vector<4x128xi1>, vector<4x128xf32>
    %cst_6 = arith.constant dense<0.000000e+00> : vector<4xf32>
    %24 = vector.multi_reduction <add>, %23, %cst_6 [1] : vector<4x128xf32> to vector<4xf32>
    %25 = vector.shape_cast %24 : vector<4xf32> to vector<4x1xf32>
    %cst_7 = arith.constant 3.125000e-02 : f32
    %26 = vector.broadcast %cst_7 : f32 to vector<4x1xf32>
    %27 = arith.mulf %25, %26 : vector<4x1xf32>
    %28 = vector.shape_cast %27 : vector<4x1xf32> to vector<4x1xf32>
    %29 = vector.broadcast %28 : vector<4x1xf32> to vector<4x128xf32>
    %30 = arith.select %21, %29, %16 : vector<4x128xi1>, vector<4x128xf32>
    %c64_i32_8 = arith.constant 64 : i32
    %31 = vector.broadcast %c64_i32_8 : i32 to vector<4x128xi32>
    %32 = arith.cmpi sge, %1, %31 : vector<4x128xi32>
    %c96_i32 = arith.constant 96 : i32
    %33 = vector.broadcast %c96_i32 : i32 to vector<4x128xi32>
    %34 = arith.cmpi slt, %1, %33 : vector<4x128xi32>
    %35 = arith.andi %32, %34 : vector<4x128xi1>
    %cst_9 = arith.constant 0.000000e+00 : f32
    %36 = vector.broadcast %cst_9 : f32 to vector<4x128xf32>
    %37 = arith.select %35, %0, %36 : vector<4x128xi1>, vector<4x128xf32>
    %cst_10 = arith.constant dense<0.000000e+00> : vector<4xf32>
    %38 = vector.multi_reduction <add>, %37, %cst_10 [1] : vector<4x128xf32> to vector<4xf32>
    %39 = vector.shape_cast %38 : vector<4xf32> to vector<4x1xf32>
    %cst_11 = arith.constant 3.125000e-02 : f32
    %40 = vector.broadcast %cst_11 : f32 to vector<4x1xf32>
    %41 = arith.mulf %39, %40 : vector<4x1xf32>
    %42 = vector.shape_cast %41 : vector<4x1xf32> to vector<4x1xf32>
    %43 = vector.broadcast %42 : vector<4x1xf32> to vector<4x128xf32>
    %44 = arith.select %35, %43, %30 : vector<4x128xi1>, vector<4x128xf32>
    %c96_i32_12 = arith.constant 96 : i32
    %45 = vector.broadcast %c96_i32_12 : i32 to vector<4x128xi32>
    %46 = arith.cmpi sge, %1, %45 : vector<4x128xi32>
    %c128_i32 = arith.constant 128 : i32
    %47 = vector.broadcast %c128_i32 : i32 to vector<4x128xi32>
    %48 = arith.cmpi slt, %1, %47 : vector<4x128xi32>
    %49 = arith.andi %46, %48 : vector<4x128xi1>
    %cst_13 = arith.constant 0.000000e+00 : f32
    %50 = vector.broadcast %cst_13 : f32 to vector<4x128xf32>
    %51 = arith.select %49, %0, %50 : vector<4x128xi1>, vector<4x128xf32>
    %cst_14 = arith.constant dense<0.000000e+00> : vector<4xf32>
    %52 = vector.multi_reduction <add>, %51, %cst_14 [1] : vector<4x128xf32> to vector<4xf32>
    %53 = vector.shape_cast %52 : vector<4xf32> to vector<4x1xf32>
    %cst_15 = arith.constant 3.125000e-02 : f32
    %54 = vector.broadcast %cst_15 : f32 to vector<4x1xf32>
    %55 = arith.mulf %53, %54 : vector<4x1xf32>
    %56 = vector.shape_cast %55 : vector<4x1xf32> to vector<4x1xf32>
    %57 = vector.broadcast %56 : vector<4x1xf32> to vector<4x128xf32>
    %58 = arith.select %49, %57, %44 : vector<4x128xi1>, vector<4x128xf32>
    %59 = arith.subf %0, %58 : vector<4x128xf32>
    %60 = arith.mulf %59, %59 : vector<4x128xf32>
    %cst_16 = arith.constant 0.000000e+00 : f32
    %61 = vector.broadcast %cst_16 : f32 to vector<4x128xf32>
    %c0_i32_17 = arith.constant 0 : i32
    %62 = vector.broadcast %c0_i32_17 : i32 to vector<4x128xi32>
    %63 = arith.cmpi sge, %1, %62 : vector<4x128xi32>
    %c32_i32_18 = arith.constant 32 : i32
    %64 = vector.broadcast %c32_i32_18 : i32 to vector<4x128xi32>
    %65 = arith.cmpi slt, %1, %64 : vector<4x128xi32>
    %66 = arith.andi %63, %65 : vector<4x128xi1>
    %cst_19 = arith.constant 0.000000e+00 : f32
    %67 = vector.broadcast %cst_19 : f32 to vector<4x128xf32>
    %68 = arith.select %66, %60, %67 : vector<4x128xi1>, vector<4x128xf32>
    %cst_20 = arith.constant dense<0.000000e+00> : vector<4xf32>
    %69 = vector.multi_reduction <add>, %68, %cst_20 [1] : vector<4x128xf32> to vector<4xf32>
    %70 = vector.shape_cast %69 : vector<4xf32> to vector<4x1xf32>
    %cst_21 = arith.constant 0.0322580636 : f32
    %71 = vector.broadcast %cst_21 : f32 to vector<4x1xf32>
    %72 = arith.mulf %70, %71 : vector<4x1xf32>
    %73 = vector.shape_cast %72 : vector<4x1xf32> to vector<4x1xf32>
    %74 = vector.broadcast %73 : vector<4x1xf32> to vector<4x128xf32>
    %75 = arith.select %66, %74, %61 : vector<4x128xi1>, vector<4x128xf32>
    %c32_i32_22 = arith.constant 32 : i32
    %76 = vector.broadcast %c32_i32_22 : i32 to vector<4x128xi32>
    %77 = arith.cmpi sge, %1, %76 : vector<4x128xi32>
    %c64_i32_23 = arith.constant 64 : i32
    %78 = vector.broadcast %c64_i32_23 : i32 to vector<4x128xi32>
    %79 = arith.cmpi slt, %1, %78 : vector<4x128xi32>
    %80 = arith.andi %77, %79 : vector<4x128xi1>
    %cst_24 = arith.constant 0.000000e+00 : f32
    %81 = vector.broadcast %cst_24 : f32 to vector<4x128xf32>
    %82 = arith.select %80, %60, %81 : vector<4x128xi1>, vector<4x128xf32>
    %cst_25 = arith.constant dense<0.000000e+00> : vector<4xf32>
    %83 = vector.multi_reduction <add>, %82, %cst_25 [1] : vector<4x128xf32> to vector<4xf32>
    %84 = vector.shape_cast %83 : vector<4xf32> to vector<4x1xf32>
    %cst_26 = arith.constant 0.0322580636 : f32
    %85 = vector.broadcast %cst_26 : f32 to vector<4x1xf32>
    %86 = arith.mulf %84, %85 : vector<4x1xf32>
    %87 = vector.shape_cast %86 : vector<4x1xf32> to vector<4x1xf32>
    %88 = vector.broadcast %87 : vector<4x1xf32> to vector<4x128xf32>
    %89 = arith.select %80, %88, %75 : vector<4x128xi1>, vector<4x128xf32>
    %c64_i32_27 = arith.constant 64 : i32
    %90 = vector.broadcast %c64_i32_27 : i32 to vector<4x128xi32>
    %91 = arith.cmpi sge, %1, %90 : vector<4x128xi32>
    %c96_i32_28 = arith.constant 96 : i32
    %92 = vector.broadcast %c96_i32_28 : i32 to vector<4x128xi32>
    %93 = arith.cmpi slt, %1, %92 : vector<4x128xi32>
    %94 = arith.andi %91, %93 : vector<4x128xi1>
    %cst_29 = arith.constant 0.000000e+00 : f32
    %95 = vector.broadcast %cst_29 : f32 to vector<4x128xf32>
    %96 = arith.select %94, %60, %95 : vector<4x128xi1>, vector<4x128xf32>
    %cst_30 = arith.constant dense<0.000000e+00> : vector<4xf32>
    %97 = vector.multi_reduction <add>, %96, %cst_30 [1] : vector<4x128xf32> to vector<4xf32>
    %98 = vector.shape_cast %97 : vector<4xf32> to vector<4x1xf32>
    %cst_31 = arith.constant 0.0322580636 : f32
    %99 = vector.broadcast %cst_31 : f32 to vector<4x1xf32>
    %100 = arith.mulf %98, %99 : vector<4x1xf32>
    %101 = vector.shape_cast %100 : vector<4x1xf32> to vector<4x1xf32>
    %102 = vector.broadcast %101 : vector<4x1xf32> to vector<4x128xf32>
    %103 = arith.select %94, %102, %89 : vector<4x128xi1>, vector<4x128xf32>
    %c96_i32_32 = arith.constant 96 : i32
    %104 = vector.broadcast %c96_i32_32 : i32 to vector<4x128xi32>
    %105 = arith.cmpi sge, %1, %104 : vector<4x128xi32>
    %c128_i32_33 = arith.constant 128 : i32
    %106 = vector.broadcast %c128_i32_33 : i32 to vector<4x128xi32>
    %107 = arith.cmpi slt, %1, %106 : vector<4x128xi32>
    %108 = arith.andi %105, %107 : vector<4x128xi1>
    %cst_34 = arith.constant 0.000000e+00 : f32
    %109 = vector.broadcast %cst_34 : f32 to vector<4x128xf32>
    %110 = arith.select %108, %60, %109 : vector<4x128xi1>, vector<4x128xf32>
    %cst_35 = arith.constant dense<0.000000e+00> : vector<4xf32>
    %111 = vector.multi_reduction <add>, %110, %cst_35 [1] : vector<4x128xf32> to vector<4xf32>
    %112 = vector.shape_cast %111 : vector<4xf32> to vector<4x1xf32>
    %cst_36 = arith.constant 0.0322580636 : f32
    %113 = vector.broadcast %cst_36 : f32 to vector<4x1xf32>
    %114 = arith.mulf %112, %113 : vector<4x1xf32>
    %115 = vector.shape_cast %114 : vector<4x1xf32> to vector<4x1xf32>
    %116 = vector.broadcast %115 : vector<4x1xf32> to vector<4x128xf32>
    %117 = arith.select %108, %116, %103 : vector<4x128xi1>, vector<4x128xf32>
    %c0_37 = arith.constant 0 : index
    %118 = memref.load %arg1[%c0_37] : memref<1xf32, #tpu.memory_space<smem>>
    %cst_38 = arith.constant 9.99999997E-7 : f32
    %119 = vector.broadcast %cst_38 : f32 to vector<4x128xf32>
    %120 = arith.addf %117, %119 : vector<4x128xf32>
    %121 = math.rsqrt %120 : vector<4x128xf32>
    %122 = vector.broadcast %118 : f32 to vector<4x128xf32>
    %123 = arith.mulf %122, %121 : vector<4x128xf32>
    %124 = arith.mulf %59, %123 : vector<4x128xf32>
    %c0_39 = arith.constant 0 : index
    %125 = memref.load %arg2[%c0_39] : memref<1xf32, #tpu.memory_space<smem>>
    %126 = vector.broadcast %125 : f32 to vector<4x128xf32>
    %127 = arith.addf %124, %126 : vector<4x128xf32>
    %c0_40 = arith.constant 0 : index
    %c0_41 = arith.constant 0 : index
    %128 = vector.load %arg4[%c0_40, %c0_41] : memref<4x128xf32, #tpu.memory_space<vmem>>, vector<4x128xf32>
    tpu.vector_store %arg4[%c0_40, %c0_41], %127 {strides = array<i32>} : memref<4x128xf32, #tpu.memory_space<vmem>>, vector<4x128xf32>,
    return
  }
  func.func @transform_0(%arg0: i32) -> i32 {
    %c0_i32 = arith.constant 0 : i32
    %c0_i32_0 = arith.constant 0 : i32
    return %c0_i32 : i32
  }
  func.func @transform_1(%arg0: i32) -> i32 {
    %c0_i32 = arith.constant 0 : i32
    %c0_i32_0 = arith.constant 0 : i32
    return %c0_i32 : i32
  }
  func.func @transform_2(%arg0: i32) -> (i32, i32) {
    %c0_i32 = arith.constant 0 : i32
    %c0_i32_0 = arith.constant 0 : i32
    return %arg0, %c0_i32 : i32, i32
  }
  func.func @transform_3(%arg0: i32) -> (i32, i32) {
    %c0_i32 = arith.constant 0 : i32
    %c0_i32_0 = arith.constant 0 : i32
    return %arg0, %c0_i32 : i32, i32
  }
}

</mosaic_0001>

<bundles_post_ra>
// kernel: tpu_custom_call.1
= control target key start
LH: loop header
LB: loop body
LE: loop exit
PB: predicated region body
PF: predicated region fallthrough
CT: control target
= control target key end

     0   :  { %v18_v0 = vlaneseq  ;;  %s216_s0 = inlined_call_operand.<no memory space> [shape: f32[1], index: 0, kind: input, shape index: {}]   ;;  %s217_s1 = inlined_call_operand.<no memory space> [shape: f32[1], index: 1, kind: input, shape index: {}]   ;;  %s218_s2 = inlined_call_operand.vmem [shape: f32[4,128], index: 2, kind: input, shape index: {}]   ;;  %s219_s3 = inlined_call_operand.hbm [shape: f32[4,128], index: 3, kind: output, shape index: {}]  }
   0x1   :  { %10 = vsyncpa [#allocation5], 0  ;;  %v17_v1 = vld [vmem:[%s218_s2] sm:$0xf]  ;;  %vm24_vm0 = vcmask 1043456   ;;  %v86_v48 = vstv %s216_s0  ;;  %v90_v51 = vstv %s217_s1  ;;  %s134_s17 = smov [#allocation4]  }
   0x2   :  { %v19_v2 = vand.u32 127, %v18_v0  ;;  %s99_s18 = sshll.u32 %s134_s17, 4  ;;  %s100_s18 = int_to_ptr.vmem [resolvable:$true] %s99_s18 }
   0x3   :  { %s110_s19 = scalar_lea.vmem %s100_s18, 64  ;;  %p115_p1 = scmp.lt.s32.totalorder %s100_s18, %s100_s18 }
   0x4   :  { %vm21_vm1 = vcmp.lt.s32.totalorder %v19_v2, 32  ;;  %vm39_vm2 = vcmp.ge.s32.totalorder %v19_v2, 64  ;;  %vm40_vm3 = vcmp.lt.s32.totalorder %v19_v2, 96  ;;  %vm30_vm4 = vcmp.ge.s32.totalorder %v19_v2, 32  ;;  %p111_p0 = scmp.ne.s32.totalorder %s100_s18, %s110_s19  ;;  %p116_p2 = scmp.lt.s32.totalorder %s110_s19, %s110_s19 }
   0x5   :  { %v23_v3 = vsel %vm21_vm1, %v17_v1, 0.0  ;;  %vm159_vm5 = vmand %vm39_vm2, %vm40_vm3  ;;  %vm31_vm6 = vcmp.lt.s32.totalorder %v19_v2, 64  ;;  %vm48_vm7 = vcmp.ge.s32.totalorder %v19_v2, 96 }
   0x6   :  { %v25_v5 = vsel %vm24_vm0, %v23_v3, 0.0  ;;  %v42_v6 = vsel %vm159_vm5, %v17_v1, 0.0  ;;  %vm166_vm8 = vmand %vm30_vm4, %vm31_vm6  ;;  %v51_v8 = vsel %vm48_vm7, %v17_v1, 0.0  ;;  %p117_p3 = por %p116_p2, %p115_p1 }
   0x7   :  { %26 = vadd.xlane.f32.xlu0 %v25_v5  ;;  %v43_v9 = vsel %vm24_vm0, %v42_v6, 0.0  ;;  %v33_v10 = vsel %vm166_vm8, %v17_v1, 0.0  ;;  %v52_v12 = vsel %vm24_vm0, %v51_v8, 0.0 }
   0x8   :  { %44 = vadd.xlane.f32.xlu1 %v43_v9  ;;  %v34_v11 = vsel %vm24_vm0, %v33_v10, 0.0  ;;  %p118_p4 = pnand %p117_p3, %p111_p0 }
   0xb   :  { %35 = vadd.xlane.f32.xlu0 %v34_v11 }
   0xc   :  { %53 = vadd.xlane.f32.xlu1 %v52_v12 }
  0x94   :  { %v27_v13 = vpop.xlane.xlu0 %26 }
  0x95   :  { %v45_v14 = vpop.xlane.xlu1 %44  ;;  %v28_v15 = vmul.f32 0.03125, %v27_v13 }
  0x96   :  { %v46_v20 = vmul.f32 0.03125, %v45_v14 }
  0x97   :  { %v29_v19 = vsel %vm21_vm1, %v28_v15, 0.0 }
  0x98   :  { %v36_v16 = vpop.xlane.xlu0 %35 }
  0x99   :  { %v37_v17 = vmul.f32 0.03125, %v36_v16  ;;  %v54_v18 = vpop.xlane.xlu1 %53 }
  0x9a   :  { %v55_v21 = vmul.f32 0.03125, %v54_v18 }
  0x9b   :  { %v38_v22 = vsel %vm166_vm8, %v37_v17, %v29_v19 }
  0x9c   :  { %v47_v23 = vsel %vm159_vm5, %v46_v20, %v38_v22 }
  0x9d   :  { %v56_v24 = vsel %vm48_vm7, %v55_v21, %v47_v23 }
  0x9e   :  { %v57_v25 = vsub.f32 %v17_v1, %v56_v24 }
  0xa0   :  { %v58_v26 = vmul.f32 %v57_v25, %v57_v25 }
  0xa2   :  { %v65_v27 = vsel %vm166_vm8, %v58_v26, 0.0  ;;  %v59_v28 = vsel %vm21_vm1, %v58_v26, 0.0  ;;  %v77_v31 = vsel %vm48_vm7, %v58_v26, 0.0  ;;  %v71_v32 = vsel %vm159_vm5, %v58_v26, 0.0 }
  0xa3   :  { %v66_v29 = vsel %vm24_vm0, %v65_v27, 0.0  ;;  %v60_v30 = vsel %vm24_vm0, %v59_v28, 0.0  ;;  %v78_v33 = vsel %vm24_vm0, %v77_v31, 0.0  ;;  %v72_v34 = vsel %vm24_vm0, %v71_v32, 0.0 }
  0xa4   :  { %67 = vadd.xlane.f32.xlu1 %v66_v29  ;;  %61 = vadd.xlane.f32.xlu0 %v60_v30 }
  0xa8   :  { %79 = vadd.xlane.f32.xlu1 %v78_v33  ;;  %73 = vadd.xlane.f32.xlu0 %v72_v34 }
 0x131   :  { %v68_v35 = vpop.xlane.xlu1 %67  ;;  %v62_v36 = vpop.xlane.xlu0 %61 }
 0x132   :  { %v63_v37 = vmul.f32 0.032258064, %v62_v36  ;;  %v69_v38 = vmul.f32 0.032258064, %v68_v35 }
 0x134   :  { %v64_v39 = vsel %vm21_vm1, %v63_v37, 0.0 }
 0x135   :  { %v80_v40 = vpop.xlane.xlu1 %79  ;;  %v74_v41 = vpop.xlane.xlu0 %73  ;;  %v70_v44 = vsel %vm166_vm8, %v69_v38, %v64_v39 }
 0x136   :  { %v81_v42 = vmul.f32 0.032258064, %v80_v40  ;;  %v75_v43 = vmul.f32 0.032258064, %v74_v41 }
 0x138   :  { %v76_v45 = vsel %vm159_vm5, %v75_v43, %v70_v44 }
 0x139   :  { %v82_v46 = vsel %vm48_vm7, %v81_v42, %v76_v45 }
 0x13a   :  { %v84_v47 = vadd.f32 1e-06, %v82_v46 }
 0x13c   :  { %108 = vrsqrt.f32 %v84_v47 }
 0x146   :  { %v109_v49 = vpop.eup %108 }
 0x147   :  { %v87_v50 = vmul.f32 %v109_v49, %v86_v48 }
 0x149   :  { %v88_v52 = vmul.f32 %v87_v50, %v57_v25 }
 0x14b   :  { %v91_v53 = vadd.f32 %v90_v51, %v88_v52 }
 0x14d   :  { %92 = vst [vmem:[#allocation4] sm:$0xf] %v91_v53 }
 0x14e   :  { %121 = shalt.err (!%p118_p4)
}
 0x14f   :  { %s122_s21 = scalar_lea.hbm %s219_s3, 64 }
 0x150   :  { %p123_p5 = scmp.ne.s32.totalorder %s219_s3, %s122_s21  ;;  %p126_p6 = scmp.lt.u32.totalorder %s122_s21, %s219_s3 }
 0x152   :  { %p128_p7 = pnand %p126_p6, %p123_p5 }
 0x154   :  { %131 = shalt.err (!%p128_p7)
}
 0x155   :  { %102 = dma.vmem_to_hbm [thread:$0]  %s100_s18, 64, %s219_s3, [#allocation5]  }
 0x156   :  { %132 = dma.done.wait [#allocation5], 64  }
 0x157   :  { %133 = vsyncadd [#allocation5], 4294967232 }
 0x158   :  { %106 = vsyncpa [#allocation5], 1 }

</bundles_post_ra>
